<compile_context>
chip_gen: v7x
topology: tpu7x:2x2x1
jax: 0.10.0
libtpu: 0.0.40
codegen_flags: <defaults>
</compile_context>

<pallas_src>
import functools

import jax
import jax.numpy as jnp
from jax import lax
from jax.experimental import pallas as pl
from jax.experimental.pallas import tpu as pltpu

EPS = 1e-5


def _residual_block_kernel(a_ref, w1s_ref, bs_ref, g1_ref, be1_ref,
                           w2_ref, g2_ref, be2_ref,
                           o_ref, col2_ref, *, L, BL):
    """Activations live as (channels, B*L flattened on lanes).

    Column j = b*L + l ; columns >= BL are zero padding up to a multiple of 128
    so every matmul result / store is lane-dense.
    """
    _, Np = a_ref.shape
    Cout = w1s_ref.shape[0] // 2
    K = w2_ref.shape[1] // Cout
    pad = K // 2
    inv_n = 1.0 / float(BL)

    # ---- conv1 + shortcut fused into ONE MXU matmul (contraction = K*C_in) ----
    hr = jnp.dot(w1s_ref[...], a_ref[...], preferred_element_type=jnp.float32)
    h1 = hr[:Cout, :]                      # conv1 output (bias dropped: BN cancels it)
    res = hr[Cout:, :] + bs_ref[...]       # shortcut keeps its bias (no BN on this path)

    # ---- hoisted lane-index masks (reused by BN masking and conv2 taps) ----
    j_idx = lax.broadcasted_iota(jnp.int32, (1, Np), 1)
    l_idx = j_idx % L
    in_batch = j_idx < BL
    valid_f = in_batch.astype(jnp.float32)

    # ---- BatchNorm1 (training-mode batch stats over B*L) + ReLU ----
    mean1 = jnp.sum(h1, axis=1, keepdims=True) * inv_n        # padded cols of h1 are 0
    c1 = (h1 - mean1) * valid_f
    var1 = jnp.sum(c1 * c1, axis=1, keepdims=True) * inv_n
    scale1 = lax.rsqrt(var1 + EPS) * g1_ref[...]
    y1 = jnp.maximum((h1 - mean1) * scale1 + be1_ref[...], 0.0)    # (Cout, Np)

    # ---- conv2 im2col via masked lane rolls (XLU), then ONE matmul ----
    for k in range(K):
        s = k - pad
        shifted = y1 if s == 0 else pltpu.roll(y1, shift=(-s) % Np, axis=1)
        ok = in_batch & (l_idx + s >= 0) & (l_idx + s < L)     # conv 'same' zero padding
        col2_ref[k * Cout:(k + 1) * Cout, :] = jnp.where(ok, shifted, 0.0)

    h2 = jnp.dot(w2_ref[...], col2_ref[...], preferred_element_type=jnp.float32)

    # ---- BatchNorm2 + residual add + ReLU ----
    mean2 = jnp.sum(h2, axis=1, keepdims=True) * inv_n         # padded cols of h2 are 0
    c2 = (h2 - mean2) * valid_f
    var2 = jnp.sum(c2 * c2, axis=1, keepdims=True) * inv_n
    scale2 = lax.rsqrt(var2 + EPS) * g2_ref[...]
    y2 = (h2 - mean2) * scale2 + be2_ref[...]
    o_ref[...] = jnp.maximum(y2 + res, 0.0)


def residual_block_1d(x, params):
    """x: (B, C_in, L) float32 -> (B, C_out, L) float32."""
    w1, b1, g1, be1, w2, b2, g2, be2, ws, bs = params
    del b1, b2  # per-channel conv biases are exactly cancelled by training-mode BN
    B, Cin, L = x.shape
    Cout, _, K = w1.shape
    pad = K // 2
    BL = B * L
    Np = ((BL + 127) // 128) * 128         # lane-dense padded column count

    # Layout plumbing (wrapper side): im2col of the zero-padded input so each
    # conv is a single (C_out, K*C_in) x (K*C_in, B*L) matmul in the kernel.
    xpad = jnp.pad(x.astype(jnp.float32), ((0, 0), (0, 0), (pad, pad)))
    cols = jnp.stack([xpad[:, :, k:k + L] for k in range(K)], axis=1)  # (B,K,Cin,L)
    a = jnp.transpose(cols, (1, 2, 0, 3)).reshape(K * Cin, BL)         # row = k*Cin+ci
    a = jnp.pad(a, ((0, 0), (0, Np - BL)))

    # weights (Cout, Cin, K) -> (Cout, K*Cin), row-index k*Cin + ci
    def wr(w):
        return jnp.transpose(w, (0, 2, 1)).reshape(w.shape[0], -1).astype(jnp.float32)

    w1s = jnp.concatenate([wr(w1), wr(ws)], axis=0)    # fused conv1 + shortcut weights
    w2r = wr(w2)
    colv = lambda v: v.reshape(-1, 1).astype(jnp.float32)

    vmem = pl.BlockSpec(memory_space=pltpu.MemorySpace.VMEM)
    kernel = functools.partial(_residual_block_kernel, L=L, BL=BL)

    # TODO(synk): for large B*L add an L-tiled grid (conv+stats accumulate pass,
    # then normalize+conv2 pass) instead of this single fully-resident block.
    out_flat = pl.pallas_call(
        kernel,
        out_shape=jax.ShapeDtypeStruct((Cout, Np), jnp.float32),
        in_specs=[vmem] * 8,
        out_specs=vmem,
        scratch_shapes=[pltpu.VMEM((K * Cout, Np), jnp.float32)],   # conv2 im2col
        compiler_params=pltpu.CompilerParams(vmem_limit_bytes=32 * 1024 * 1024),
    )(a, w1s, colv(bs), colv(g1), colv(be1), w2r, colv(g2), colv(be2))

    # (Cout, B*L) -> (B, Cout, L)
    return out_flat[:, :BL].reshape(Cout, B, L).transpose(1, 0, 2)


def _reference(x, params):
    """Pure-JAX reference with identical semantics (sanity check)."""
    w1, b1, g1, be1, w2, b2, g2, be2, ws, bs = params
    pad = w1.shape[-1] // 2
    dn = ('NCH', 'OIH', 'NCH')

    def conv(v, w, b):
        return lax.conv_general_dilated(v, w, window_strides=(1,),
                                        padding=[(pad, pad)],
                                        dimension_numbers=dn) + b[None, :, None]

    def bn(v, g, be):
        m = jnp.mean(v, axis=(0, 2), keepdims=True)
        var = jnp.mean((v - m) ** 2, axis=(0, 2), keepdims=True)
        return (v - m) * lax.rsqrt(var + EPS) * g[None, :, None] + be[None, :, None]

    residual = conv(x, ws, bs)
    out = jnp.maximum(bn(conv(x, w1, b1), g1, be1), 0.0)
    out = bn(conv(out, w2, b2), g2, be2)
    return jnp.maximum(out + residual, 0.0)


if __name__ == "__main__":
    B, Cin, Cout, L, K = 2, 4, 8, 16, 5
    key = jax.random.PRNGKey(0)
    ks = jax.random.split(key, 7)

    x = jax.random.normal(ks[0], (B, Cin, L), jnp.float32)
    w1 = jax.random.normal(ks[1], (Cout, Cin, K), jnp.float32) * 0.2
    b1 = jax.random.normal(ks[2], (Cout,), jnp.float32) * 0.1
    w2 = jax.random.normal(ks[3], (Cout, Cout, K), jnp.float32) * 0.2
    b2 = jax.random.normal(ks[4], (Cout,), jnp.float32) * 0.1
    ws = jax.random.normal(ks[5], (Cout, Cin, K), jnp.float32) * 0.2
    bs = jax.random.normal(ks[6], (Cout,), jnp.float32) * 0.1
    # BatchNorm1d default init: weight (gamma) = 1, bias (beta) = 0
    g1 = jnp.ones((Cout,), jnp.float32); be1 = jnp.zeros((Cout,), jnp.float32)
    g2 = jnp.ones((Cout,), jnp.float32); be2 = jnp.zeros((Cout,), jnp.float32)

    params = (w1, b1, g1, be1, w2, b2, g2, be2, ws, bs)

    out = residual_block_1d(x, params)
    out = jax.block_until_ready(out)

    ref = _reference(x, params)
    assert out.shape == (B, Cout, L), out.shape
    assert jnp.allclose(out, ref, atol=1e-4, rtol=1e-4), \
        float(jnp.max(jnp.abs(out - ref)))
    print("KERNEL_OK")
</pallas_src>

<mosaic_0001>
module attributes {stable_mosaic.version = 11 : i64} {
  func.func @_residual_block_kernel(%arg0: memref<20x128xf32, #tpu.memory_space<vmem>>, %arg1: memref<16x20xf32, #tpu.memory_space<vmem>>, %arg2: memref<8x1xf32, #tpu.memory_space<vmem>>, %arg3: memref<8x1xf32, #tpu.memory_space<vmem>>, %arg4: memref<8x1xf32, #tpu.memory_space<vmem>>, %arg5: memref<8x40xf32, #tpu.memory_space<vmem>>, %arg6: memref<8x1xf32, #tpu.memory_space<vmem>>, %arg7: memref<8x1xf32, #tpu.memory_space<vmem>>, %arg8: memref<8x128xf32, #tpu.memory_space<vmem>>, %arg9: memref<40x128xf32, #tpu.memory_space<vmem>>) attributes {dimension_semantics = [], scalar_prefetch = 0 : i64, scratch_operands = 1 : i64, tpu.core_type = #tpu.core_type<tc>} {
    %c0 = arith.constant 0 : index
    %c0_0 = arith.constant 0 : index
    %0 = vector.load %arg1[%c0, %c0_0] : memref<16x20xf32, #tpu.memory_space<vmem>>, vector<16x20xf32>
    %c0_1 = arith.constant 0 : index
    %c0_2 = arith.constant 0 : index
    %1 = vector.load %arg0[%c0_1, %c0_2] : memref<20x128xf32, #tpu.memory_space<vmem>>, vector<20x128xf32>
    %cst = arith.constant dense<0.000000e+00> : vector<16x128xf32>
    %2 = tpu.matmul %0, %1, %cst {dimension_numbers = #tpu.dot_dimension_numbers<[1], [0], [0], [1], [0, 0, 1, 1], [], []>} : vector<16x20xf32>, vector<20x128xf32>, vector<16x128xf32> -> vector<16x128xf32>
    %3 = vector.extract_strided_slice %2 {offsets = [0, 0], sizes = [8, 128], strides = [1, 1]} : vector<16x128xf32> to vector<8x128xf32>
    %4 = vector.extract_strided_slice %2 {offsets = [8, 0], sizes = [8, 128], strides = [1, 1]} : vector<16x128xf32> to vector<8x128xf32>
    %c0_3 = arith.constant 0 : index
    %c0_4 = arith.constant 0 : index
    %5 = vector.load %arg2[%c0_3, %c0_4] : memref<8x1xf32, #tpu.memory_space<vmem>>, vector<8x1xf32>
    %6 = vector.broadcast %5 : vector<8x1xf32> to vector<8x128xf32>
    %7 = arith.addf %4, %6 : vector<8x128xf32>
    %8 = tpu.iota {dimensions = array<i32: 1>} : vector<1x128xi32>
    %c16_i32 = arith.constant 16 : i32
    %c0_i32 = arith.constant 0 : i32
    %9 = arith.cmpi eq, %c16_i32, %c0_i32 : i32
    %c1_i32 = arith.constant 1 : i32
    %10 = arith.select %9, %c1_i32, %c16_i32 : i32
    %11 = vector.broadcast %10 : i32 to vector<1x128xi32>
    %12 = arith.remsi %8, %11 : vector<1x128xi32>
    %c0_i32_5 = arith.constant 0 : i32
    %13 = vector.broadcast %c0_i32_5 : i32 to vector<1x128xi32>
    %14 = arith.cmpi ne, %12, %13 : vector<1x128xi32>
    %c0_i32_6 = arith.constant 0 : i32
    %15 = vector.broadcast %c0_i32_6 : i32 to vector<1x128xi32>
    %16 = arith.cmpi slt, %12, %15 : vector<1x128xi32>
    %c0_i32_7 = arith.constant 0 : i32
    %17 = arith.cmpi slt, %10, %c0_i32_7 : i32
    %18 = vector.broadcast %17 : i1 to vector<1x128xi1>
    %19 = vector.broadcast %18 : vector<1x128xi1> to vector<1x128xi1>
    %20 = arith.xori %16, %19 : vector<1x128xi1>
    %21 = arith.andi %20, %14 : vector<1x128xi1>
    %22 = vector.broadcast %10 : i32 to vector<1x128xi32>
    %23 = arith.addi %12, %22 : vector<1x128xi32>
    %24 = arith.select %21, %23, %12 : vector<1x128xi1>, vector<1x128xi32>
    %c32_i32 = arith.constant 32 : i32
    %25 = vector.broadcast %c32_i32 : i32 to vector<1x128xi32>
    %26 = arith.cmpi slt, %8, %25 : vector<1x128xi32>
    %27 = arith.extui %26 : vector<1x128xi1> to vector<1x128xi32>
    %28 = arith.sitofp %27 : vector<1x128xi32> to vector<1x128xf32>
    %cst_8 = arith.constant dense<0.000000e+00> : vector<8xf32>
    %29 = vector.multi_reduction <add>, %3, %cst_8 [1] : vector<8x128xf32> to vector<8xf32>
    %30 = vector.shape_cast %29 : vector<8xf32> to vector<8x1xf32>
    %cst_9 = arith.constant 3.125000e-02 : f32
    %31 = vector.broadcast %cst_9 : f32 to vector<8x1xf32>
    %32 = arith.mulf %30, %31 : vector<8x1xf32>
    %33 = vector.broadcast %32 : vector<8x1xf32> to vector<8x128xf32>
    %34 = arith.subf %3, %33 : vector<8x128xf32>
    %35 = vector.broadcast %28 : vector<1x128xf32> to vector<8x128xf32>
    %36 = arith.mulf %34, %35 : vector<8x128xf32>
    %37 = arith.mulf %36, %36 : vector<8x128xf32>
    %cst_10 = arith.constant dense<0.000000e+00> : vector<8xf32>
    %38 = vector.multi_reduction <add>, %37, %cst_10 [1] : vector<8x128xf32> to vector<8xf32>
    %39 = vector.shape_cast %38 : vector<8xf32> to vector<8x1xf32>
    %cst_11 = arith.constant 3.125000e-02 : f32
    %40 = vector.broadcast %cst_11 : f32 to vector<8x1xf32>
    %41 = arith.mulf %39, %40 : vector<8x1xf32>
    %cst_12 = arith.constant 9.99999974E-6 : f32
    %42 = vector.broadcast %cst_12 : f32 to vector<8x1xf32>
    %43 = arith.addf %41, %42 : vector<8x1xf32>
    %44 = math.rsqrt %43 : vector<8x1xf32>
    %c0_13 = arith.constant 0 : index
    %c0_14 = arith.constant 0 : index
    %45 = vector.load %arg3[%c0_13, %c0_14] : memref<8x1xf32, #tpu.memory_space<vmem>>, vector<8x1xf32>
    %46 = arith.mulf %44, %45 : vector<8x1xf32>
    %47 = vector.broadcast %32 : vector<8x1xf32> to vector<8x128xf32>
    %48 = arith.subf %3, %47 : vector<8x128xf32>
    %49 = vector.broadcast %46 : vector<8x1xf32> to vector<8x128xf32>
    %50 = arith.mulf %48, %49 : vector<8x128xf32>
    %c0_15 = arith.constant 0 : index
    %c0_16 = arith.constant 0 : index
    %51 = vector.load %arg4[%c0_15, %c0_16] : memref<8x1xf32, #tpu.memory_space<vmem>>, vector<8x1xf32>
    %52 = vector.broadcast %51 : vector<8x1xf32> to vector<8x128xf32>
    %53 = arith.addf %50, %52 : vector<8x128xf32>
    %cst_17 = arith.constant 0.000000e+00 : f32
    %54 = vector.broadcast %cst_17 : f32 to vector<8x128xf32>
    %55 = arith.maximumf %53, %54 : vector<8x128xf32>
    %c2_i32 = arith.constant 2 : i32
    %56 = tpu.dynamic_rotate %55 by %c2_i32 dim 1 : vector<8x128xf32>, i32 -> vector<8x128xf32>
    %c-2_i32 = arith.constant -2 : i32
    %57 = vector.broadcast %c-2_i32 : i32 to vector<1x128xi32>
    %58 = arith.addi %24, %57 : vector<1x128xi32>
    %c0_i32_18 = arith.constant 0 : i32
    %59 = vector.broadcast %c0_i32_18 : i32 to vector<1x128xi32>
    %60 = arith.cmpi sge, %58, %59 : vector<1x128xi32>
    %61 = arith.andi %26, %60 : vector<1x128xi1>
    %c-2_i32_19 = arith.constant -2 : i32
    %62 = vector.broadcast %c-2_i32_19 : i32 to vector<1x128xi32>
    %63 = arith.addi %24, %62 : vector<1x128xi32>
    %c16_i32_20 = arith.constant 16 : i32
    %64 = vector.broadcast %c16_i32_20 : i32 to vector<1x128xi32>
    %65 = arith.cmpi slt, %63, %64 : vector<1x128xi32>
    %66 = arith.andi %61, %65 : vector<1x128xi1>
    %cst_21 = arith.constant 0.000000e+00 : f32
    %67 = vector.shape_cast %66 : vector<1x128xi1> to vector<1x128xi1>
    %68 = vector.broadcast %67 : vector<1x128xi1> to vector<8x128xi1>
    %69 = vector.broadcast %cst_21 : f32 to vector<8x128xf32>
    %70 = arith.select %68, %56, %69 : vector<8x128xi1>, vector<8x128xf32>
    %c0_22 = arith.constant 0 : index
    %c0_23 = arith.constant 0 : index
    %71 = vector.load %arg9[%c0_22, %c0_23] : memref<40x128xf32, #tpu.memory_space<vmem>>, vector<8x128xf32>
    tpu.vector_store %arg9[%c0_22, %c0_23], %70 {strides = array<i32>} : memref<40x128xf32, #tpu.memory_space<vmem>>, vector<8x128xf32>,
    %c1_i32_24 = arith.constant 1 : i32
    %72 = tpu.dynamic_rotate %55 by %c1_i32_24 dim 1 : vector<8x128xf32>, i32 -> vector<8x128xf32>
    %c-1_i32 = arith.constant -1 : i32
    %73 = vector.broadcast %c-1_i32 : i32 to vector<1x128xi32>
    %74 = arith.addi %24, %73 : vector<1x128xi32>
    %c0_i32_25 = arith.constant 0 : i32
    %75 = vector.broadcast %c0_i32_25 : i32 to vector<1x128xi32>
    %76 = arith.cmpi sge, %74, %75 : vector<1x128xi32>
    %77 = arith.andi %26, %76 : vector<1x128xi1>
    %c-1_i32_26 = arith.constant -1 : i32
    %78 = vector.broadcast %c-1_i32_26 : i32 to vector<1x128xi32>
    %79 = arith.addi %24, %78 : vector<1x128xi32>
    %c16_i32_27 = arith.constant 16 : i32
    %80 = vector.broadcast %c16_i32_27 : i32 to vector<1x128xi32>
    %81 = arith.cmpi slt, %79, %80 : vector<1x128xi32>
    %82 = arith.andi %77, %81 : vector<1x128xi1>
    %cst_28 = arith.constant 0.000000e+00 : f32
    %83 = vector.shape_cast %82 : vector<1x128xi1> to vector<1x128xi1>
    %84 = vector.broadcast %83 : vector<1x128xi1> to vector<8x128xi1>
    %85 = vector.broadcast %cst_28 : f32 to vector<8x128xf32>
    %86 = arith.select %84, %72, %85 : vector<8x128xi1>, vector<8x128xf32>
    %c8 = arith.constant 8 : index
    %c0_29 = arith.constant 0 : index
    %87 = vector.load %arg9[%c8, %c0_29] : memref<40x128xf32, #tpu.memory_space<vmem>>, vector<8x128xf32>
    tpu.vector_store %arg9[%c8, %c0_29], %86 {strides = array<i32>} : memref<40x128xf32, #tpu.memory_space<vmem>>, vector<8x128xf32>,
    %c0_i32_30 = arith.constant 0 : i32
    %88 = vector.broadcast %c0_i32_30 : i32 to vector<1x128xi32>
    %89 = arith.addi %24, %88 : vector<1x128xi32>
    %c0_i32_31 = arith.constant 0 : i32
    %90 = vector.broadcast %c0_i32_31 : i32 to vector<1x128xi32>
    %91 = arith.cmpi sge, %89, %90 : vector<1x128xi32>
    %92 = arith.andi %26, %91 : vector<1x128xi1>
    %c0_i32_32 = arith.constant 0 : i32
    %93 = vector.broadcast %c0_i32_32 : i32 to vector<1x128xi32>
    %94 = arith.addi %24, %93 : vector<1x128xi32>
    %c16_i32_33 = arith.constant 16 : i32
    %95 = vector.broadcast %c16_i32_33 : i32 to vector<1x128xi32>
    %96 = arith.cmpi slt, %94, %95 : vector<1x128xi32>
    %97 = arith.andi %92, %96 : vector<1x128xi1>
    %cst_34 = arith.constant 0.000000e+00 : f32
    %98 = vector.shape_cast %97 : vector<1x128xi1> to vector<1x128xi1>
    %99 = vector.broadcast %98 : vector<1x128xi1> to vector<8x128xi1>
    %100 = vector.broadcast %cst_34 : f32 to vector<8x128xf32>
    %101 = arith.select %99, %55, %100 : vector<8x128xi1>, vector<8x128xf32>
    %c16 = arith.constant 16 : index
    %c0_35 = arith.constant 0 : index
    %102 = vector.load %arg9[%c16, %c0_35] : memref<40x128xf32, #tpu.memory_space<vmem>>, vector<8x128xf32>
    tpu.vector_store %arg9[%c16, %c0_35], %101 {strides = array<i32>} : memref<40x128xf32, #tpu.memory_space<vmem>>, vector<8x128xf32>,
    %c127_i32 = arith.constant 127 : i32
    %103 = tpu.dynamic_rotate %55 by %c127_i32 dim 1 : vector<8x128xf32>, i32 -> vector<8x128xf32>
    %c1_i32_36 = arith.constant 1 : i32
    %104 = vector.broadcast %c1_i32_36 : i32 to vector<1x128xi32>
    %105 = arith.addi %24, %104 : vector<1x128xi32>
    %c0_i32_37 = arith.constant 0 : i32
    %106 = vector.broadcast %c0_i32_37 : i32 to vector<1x128xi32>
    %107 = arith.cmpi sge, %105, %106 : vector<1x128xi32>
    %108 = arith.andi %26, %107 : vector<1x128xi1>
    %c1_i32_38 = arith.constant 1 : i32
    %109 = vector.broadcast %c1_i32_38 : i32 to vector<1x128xi32>
    %110 = arith.addi %24, %109 : vector<1x128xi32>
    %c16_i32_39 = arith.constant 16 : i32
    %111 = vector.broadcast %c16_i32_39 : i32 to vector<1x128xi32>
    %112 = arith.cmpi slt, %110, %111 : vector<1x128xi32>
    %113 = arith.andi %108, %112 : vector<1x128xi1>
    %cst_40 = arith.constant 0.000000e+00 : f32
    %114 = vector.shape_cast %113 : vector<1x128xi1> to vector<1x128xi1>
    %115 = vector.broadcast %114 : vector<1x128xi1> to vector<8x128xi1>
    %116 = vector.broadcast %cst_40 : f32 to vector<8x128xf32>
    %117 = arith.select %115, %103, %116 : vector<8x128xi1>, vector<8x128xf32>
    %c24 = arith.constant 24 : index
    %c0_41 = arith.constant 0 : index
    %118 = vector.load %arg9[%c24, %c0_41] : memref<40x128xf32, #tpu.memory_space<vmem>>, vector<8x128xf32>
    tpu.vector_store %arg9[%c24, %c0_41], %117 {strides = array<i32>} : memref<40x128xf32, #tpu.memory_space<vmem>>, vector<8x128xf32>,
    %c126_i32 = arith.constant 126 : i32
    %119 = tpu.dynamic_rotate %55 by %c126_i32 dim 1 : vector<8x128xf32>, i32 -> vector<8x128xf32>
    %c2_i32_42 = arith.constant 2 : i32
    %120 = vector.broadcast %c2_i32_42 : i32 to vector<1x128xi32>
    %121 = arith.addi %24, %120 : vector<1x128xi32>
    %c0_i32_43 = arith.constant 0 : i32
    %122 = vector.broadcast %c0_i32_43 : i32 to vector<1x128xi32>
    %123 = arith.cmpi sge, %121, %122 : vector<1x128xi32>
    %124 = arith.andi %26, %123 : vector<1x128xi1>
    %c2_i32_44 = arith.constant 2 : i32
    %125 = vector.broadcast %c2_i32_44 : i32 to vector<1x128xi32>
    %126 = arith.addi %24, %125 : vector<1x128xi32>
    %c16_i32_45 = arith.constant 16 : i32
    %127 = vector.broadcast %c16_i32_45 : i32 to vector<1x128xi32>
    %128 = arith.cmpi slt, %126, %127 : vector<1x128xi32>
    %129 = arith.andi %124, %128 : vector<1x128xi1>
    %cst_46 = arith.constant 0.000000e+00 : f32
    %130 = vector.shape_cast %129 : vector<1x128xi1> to vector<1x128xi1>
    %131 = vector.broadcast %130 : vector<1x128xi1> to vector<8x128xi1>
    %132 = vector.broadcast %cst_46 : f32 to vector<8x128xf32>
    %133 = arith.select %131, %119, %132 : vector<8x128xi1>, vector<8x128xf32>
    %c32 = arith.constant 32 : index
    %c0_47 = arith.constant 0 : index
    %134 = vector.load %arg9[%c32, %c0_47] : memref<40x128xf32, #tpu.memory_space<vmem>>, vector<8x128xf32>
    tpu.vector_store %arg9[%c32, %c0_47], %133 {strides = array<i32>} : memref<40x128xf32, #tpu.memory_space<vmem>>, vector<8x128xf32>,
    %c0_48 = arith.constant 0 : index
    %c0_49 = arith.constant 0 : index
    %135 = vector.load %arg5[%c0_48, %c0_49] : memref<8x40xf32, #tpu.memory_space<vmem>>, vector<8x40xf32>
    %c0_50 = arith.constant 0 : index
    %c0_51 = arith.constant 0 : index
    %136 = vector.load %arg9[%c0_50, %c0_51] : memref<40x128xf32, #tpu.memory_space<vmem>>, vector<40x128xf32>
    %cst_52 = arith.constant dense<0.000000e+00> : vector<8x128xf32>
    %137 = tpu.matmul %135, %136, %cst_52 {dimension_numbers = #tpu.dot_dimension_numbers<[1], [0], [0], [1], [0, 0, 1, 1], [], []>} : vector<8x40xf32>, vector<40x128xf32>, vector<8x128xf32> -> vector<8x128xf32>
    %cst_53 = arith.constant dense<0.000000e+00> : vector<8xf32>
    %138 = vector.multi_reduction <add>, %137, %cst_53 [1] : vector<8x128xf32> to vector<8xf32>
    %139 = vector.shape_cast %138 : vector<8xf32> to vector<8x1xf32>
    %cst_54 = arith.constant 3.125000e-02 : f32
    %140 = vector.broadcast %cst_54 : f32 to vector<8x1xf32>
    %141 = arith.mulf %139, %140 : vector<8x1xf32>
    %142 = vector.broadcast %141 : vector<8x1xf32> to vector<8x128xf32>
    %143 = arith.subf %137, %142 : vector<8x128xf32>
    %144 = vector.broadcast %28 : vector<1x128xf32> to vector<8x128xf32>
    %145 = arith.mulf %143, %144 : vector<8x128xf32>
    %146 = arith.mulf %145, %145 : vector<8x128xf32>
    %cst_55 = arith.constant dense<0.000000e+00> : vector<8xf32>
    %147 = vector.multi_reduction <add>, %146, %cst_55 [1] : vector<8x128xf32> to vector<8xf32>
    %148 = vector.shape_cast %147 : vector<8xf32> to vector<8x1xf32>
    %cst_56 = arith.constant 3.125000e-02 : f32
    %149 = vector.broadcast %cst_56 : f32 to vector<8x1xf32>
    %150 = arith.mulf %148, %149 : vector<8x1xf32>
    %cst_57 = arith.constant 9.99999974E-6 : f32
    %151 = vector.broadcast %cst_57 : f32 to vector<8x1xf32>
    %152 = arith.addf %150, %151 : vector<8x1xf32>
    %153 = math.rsqrt %152 : vector<8x1xf32>
    %c0_58 = arith.constant 0 : index
    %c0_59 = arith.constant 0 : index
    %154 = vector.load %arg6[%c0_58, %c0_59] : memref<8x1xf32, #tpu.memory_space<vmem>>, vector<8x1xf32>
    %155 = arith.mulf %153, %154 : vector<8x1xf32>
    %156 = vector.broadcast %141 : vector<8x1xf32> to vector<8x128xf32>
    %157 = arith.subf %137, %156 : vector<8x128xf32>
    %158 = vector.broadcast %155 : vector<8x1xf32> to vector<8x128xf32>
    %159 = arith.mulf %157, %158 : vector<8x128xf32>
    %c0_60 = arith.constant 0 : index
    %c0_61 = arith.constant 0 : index
    %160 = vector.load %arg7[%c0_60, %c0_61] : memref<8x1xf32, #tpu.memory_space<vmem>>, vector<8x1xf32>
    %161 = vector.broadcast %160 : vector<8x1xf32> to vector<8x128xf32>
    %162 = arith.addf %159, %161 : vector<8x128xf32>
    %163 = arith.addf %162, %7 : vector<8x128xf32>
    %cst_62 = arith.constant 0.000000e+00 : f32
    %164 = vector.broadcast %cst_62 : f32 to vector<8x128xf32>
    %165 = arith.maximumf %163, %164 : vector<8x128xf32>
    %c0_63 = arith.constant 0 : index
    %c0_64 = arith.constant 0 : index
    %166 = vector.load %arg8[%c0_63, %c0_64] : memref<8x128xf32, #tpu.memory_space<vmem>>, vector<8x128xf32>
    tpu.vector_store %arg8[%c0_63, %c0_64], %165 {strides = array<i32>} : memref<8x128xf32, #tpu.memory_space<vmem>>, vector<8x128xf32>,
    return
  }
}

</mosaic_0001>

<bundles_post_ra>
// kernel: tpu_custom_call.1
= control target key start
LH: loop header
LB: loop body
LE: loop exit
PB: predicated region body
PF: predicated region fallthrough
CT: control target
= control target key end

     0   :  { %vm35_vm0 = vcmask 162816   ;;  %s563_s0 = inlined_call_operand.vmem [shape: f32[20,128], index: 0, kind: input, shape index: {}]   ;;  %s564_s1 = inlined_call_operand.vmem [shape: f32[16,20], index: 1, kind: input, shape index: {}]   ;;  %s565_s2 = inlined_call_operand.vmem [shape: f32[8,1], index: 2, kind: input, shape index: {}]   ;;  %s566_s3 = inlined_call_operand.vmem [shape: f32[8,1], index: 3, kind: input, shape index: {}]   ;;  %s567_s4 = inlined_call_operand.vmem [shape: f32[8,1], index: 4, kind: input, shape index: {}]   ;;  %s568_s5 = inlined_call_operand.vmem [shape: f32[8,40], index: 5, kind: input, shape index: {}]   ;;  %s569_s6 = inlined_call_operand.vmem [shape: f32[8,1], index: 6, kind: input, shape index: {}]   ;;  %s570_s7 = inlined_call_operand.vmem [shape: f32[8,1], index: 7, kind: input, shape index: {}]   ;;  %s571_s8 = inlined_call_operand.hbm [shape: f32[8,128], index: 8, kind: output, shape index: {}]  }
   0x1   :  { %v32_v0 = vld [vmem:[%s563_s0] sm:$0xff]  ;;  %v33_v1 = vld [vmem:[%s563_s0 + $0x8] sm:$0xff] }
   0x2   :  { %v390_v2 = vpack.c.bf16 %v33_v1, %v32_v0  ;;  %v30_v3 = vld [vmem:[%s564_s1] sm:$0xff] }
   0x3   :  { %13 = vsyncpa [#allocation4], 0  ;;  %v34_v4 = vld [vmem:[%s563_s0 + $0x10] sm:$0xf]  ;;  %vm42_vm1 = vcmask 1043456   ;;  %374 = vmatprep.mubr.msk.f32.mxu0 %vm35_vm0, %v30_v3  ;;  %v31_v5 = vld [vmem:[%s564_s1 + $0x8] sm:$0xff]  ;;  %v128_v8 = vlaneseq }
   0x4   :  { %391 = vmatprep.subr.bf16.mxu0 %v390_v2  ;;  %v441_v12 = vmov 0.0   ;;  %v442_v17 = vmov 0   ;;  %v156_v21 = vld [vmem:[%s566_s3] sm:$0xff]  ;;  %v443_v25 = vmov 0.0|0.0   ;;  %vm444_vm3 = vmmov 0   ;;  %s445_s17 = smov 1  }
   0x5   :  { %393 = vmatpush3.bf16.msra.mxu0 %v390_v2  ;;  %v512_v9 = vand.u32 127, %v128_v8  ;;  %411 = vset.pattern.permute.xlu1 %v442_v17  ;;  %v164_v24 = vld [vmem:[%s567_s4] sm:$0xff]  ;;  %s446_s3 = smov 2   ;;  %s447_s18 = smov 127   ;;  %vm230_vm14 = vcmask 326656  }
   0x6   :  { %372 = vmatprep.subr.msk.mxu0 %vm42_vm1, %v34_v4  ;;  %412 = vset.pattern.permute.xlu0 %v442_v17  ;;  %s448_s19 = smov 126   ;;  %v224_v41 = vld [vmem:[%s568_s5] sm:$0xff] }
   0x7   :  { %vm142_vm2 = vcmp.lt.s32.totalorder %v512_v9, 32  ;;  %394 = vmatprep.subr.bf16.mxu1 %v443_v25  ;;  %387 = vmatprep.mubr.msk.f32.mxu1 %vm444_vm3, %v441_v12  ;;  %v134_v31 = vand.u32 15, %v512_v9  ;;  %v121_v50 = vld [vmem:[%s565_s2] sm:$0xff]  ;;  %s449_s2 = smov [#allocation3]  }
   0x8   :  { %v517_v13 = vsel %vm142_vm2, 1.0, %v441_v12  ;;  %v315_v54 = vld [vmem:[%s569_s6] sm:$0xff]  ;;  %s339_s26 = sshll.u32 %s449_s2, 4  ;;  %s340_s26 = int_to_ptr.vmem [resolvable:$true] %s339_s26 }
   0x9   :  { %373 = vmatpush3.msk.msra.mxu0 %vm42_vm1, %v34_v4  ;;  %v174_v32 = vadd.s32 4294967294, %v134_v31  ;;  %v185_v33 = vadd.s32 4294967295, %v134_v31  ;;  %v204_v34 = vadd.s32 1, %v134_v31  ;;  %v215_v38 = vadd.s32 2, %v134_v31  ;;  %v323_v57 = vld [vmem:[%s570_s7] sm:$0xff]  ;;  %s417_s6 = scalar_lea.vmem %s340_s26, 128  ;;  %p422_p1 = scmp.lt.s32.totalorder %s340_s26, %s340_s26 }
   0xa   :  { %375 = vmatmul.mubr.msk.f32.vlgmr.msra.gmra.mrb[0].mxu0 %vm35_vm0, %v31_v5  ;;  %p418_p0 = scmp.ne.s32.totalorder %s340_s26, %s417_s6  ;;  %p423_p2 = scmp.lt.s32.totalorder %s417_s6, %s417_s6 }
   0xb   :  { %vm175_vm4 = vcmp.ge.s32.totalorder %v174_v32, 0  ;;  %vm186_vm5 = vcmp.ge.s32.totalorder %v185_v33, 0  ;;  %vm207_vm8 = vcmp.lt.s32.totalorder %v204_v34, 16  ;;  %vm218_vm12 = vcmp.lt.s32.totalorder %v215_v38, 16 }
   0xc   :  { %vm176_vm6 = vmand %vm142_vm2, %vm175_vm4  ;;  %p424_p3 = por %p423_p2, %p422_p1 }
   0xd   :  { %vm187_vm7 = vmand %vm142_vm2, %vm186_vm5 }
   0xe   :  { %vm396_vm9 = vmpackc.low %vm187_vm7, %vm176_vm6  ;;  %p425_p4 = pnand %p424_p3, %p418_p0 }
   0xf   :  { %vm208_vm10 = vmand %vm142_vm2, %vm207_vm8 }
  0x10   :  { %vm400_vm11 = vmpackc.low %vm208_vm10, %vm142_vm2 }
  0x11   :  { %vm219_vm13 = vmand %vm142_vm2, %vm218_vm12 }
  0xdd   :  { %v510_v6 = vpop.f32.mrb[0].mxu0 }
  0xde   :  { %v112_v7 = vpop.f32.mrb[1].mxu0 }
  0xdf   :  { %145 = vadd.xlane.f32.xlu0 %v112_v7 }
 0x16c   :  { %v146_v10 = vpop.xlane.xlu0 %145 }
 0x16d   :  { %v147_v11 = vmul.f32 0.03125, %v146_v10 }
 0x16f   :  { %v148_v14 = vsub.f32 %v112_v7, %v147_v11 }
 0x171   :  { %v149_v15 = vmul.f32 %v517_v13, %v148_v14 }
 0x173   :  { %v150_v16 = vmul.f32 %v149_v15, %v149_v15 }
 0x175   :  { %151 = vadd.xlane.f32.xlu0 %v150_v16 }
 0x202   :  { %v152_v18 = vpop.xlane.xlu0 %151 }
 0x203   :  { %v153_v19 = vmul.f32 0.03125, %v152_v18 }
 0x205   :  { %v154_v20 = vadd.f32 1e-05, %v153_v19 }
 0x207   :  { %413 = vrsqrt.f32 %v154_v20 }
 0x211   :  { %v414_v22 = vpop.eup %413 }
 0x212   :  { %v157_v23 = vmul.f32 %v414_v22, %v156_v21 }
 0x214   :  { %160 = vperm.xlu1 %411, %v157_v23  }
 0x218   :  { %167 = vperm.xlu1 %411, %v164_v24  }
 0x293   :  { %v161_v26 = vpop.permute.xlu1 %160 }
 0x294   :  { %v163_v27 = vmul.f32 %v161_v26, %v148_v14 }
 0x297   :  { %v168_v28 = vpop.permute.xlu1 %167 }
 0x298   :  { %v170_v29 = vadd.f32 %v168_v28, %v163_v27 }
 0x29a   :  { %v171_v30 = vmax.f32 %v170_v29, 0.0 }
 0x29c   :  { %183 = vrot.lane.b32.xlu1 %v171_v30, %s445_s17  ;;  %172 = vrot.lane.b32.xlu0 %v171_v30, %s446_s3 }
 0x2a0   :  { %202 = vrot.lane.b32.xlu1 %v171_v30, %s447_s18 }
 0x2a4   :  { %213 = vrot.lane.b32.xlu1 %v171_v30, %s448_s19 }
 0x30e   :  { %v184_v35 = vpop.permute.xlu1 %183  ;;  %v173_v36 = vpop.permute.xlu0 %172 }
 0x30f   :  { %v395_v37 = vpack.c.bf16 %v184_v35, %v173_v36 }
 0x311   :  { %397 = vmatpush3.bf16.msk.msra.mxu1 %vm396_vm9, %v395_v37 }
 0x312   :  { %v203_v39 = vpop.permute.xlu1 %202  ;;  %398 = vmatprep.subr.bf16.mxu1 %v443_v25 }
 0x313   :  { %v399_v40 = vpack.c.bf16 %v203_v39, %v171_v30 }
 0x315   :  { %401 = vmatpush3.bf16.msk.msra.mxu1 %vm400_vm11, %v399_v40 }
 0x316   :  { %385 = vmatprep.subr.mxu1 %v441_v12  ;;  %v214_v42 = vpop.permute.xlu1 %213 }
 0x319   :  { %386 = vmatpush3.msk.msra.mxu1 %vm219_vm13, %v214_v42 }
 0x31a   :  { %388 = vmatmul.mubr.msk.f32.vlgmr.msra.gmra.mrb[0].mxu1 %vm230_vm14, %v224_v41 }
 0x3ed   :  { %v300_v43 = vpop.f32.mrb[0].mxu1 }
 0x3ee   :  { %304 = vadd.xlane.f32.xlu1 %v300_v43  ;;  %v389_v44 = vpop.f32.mrb[1].mxu1 }
 0x47b   :  { %v305_v45 = vpop.xlane.xlu1 %304 }
 0x47c   :  { %v306_v46 = vmul.f32 0.03125, %v305_v45 }
 0x47e   :  { %v307_v47 = vsub.f32 %v300_v43, %v306_v46 }
 0x480   :  { %v308_v48 = vmul.f32 %v517_v13, %v307_v47 }
 0x482   :  { %v309_v49 = vmul.f32 %v308_v48, %v308_v48 }
 0x484   :  { %310 = vadd.xlane.f32.xlu0 %v309_v49 }
 0x49a   :  { %124 = vperm.xlu0 %412, %v121_v50  }
 0x511   :  { %v311_v51 = vpop.xlane.xlu0 %310 }
 0x512   :  { %v312_v52 = vmul.f32 0.03125, %v311_v51 }
 0x514   :  { %v313_v53 = vadd.f32 1e-05, %v312_v52 }
 0x516   :  { %415 = vrsqrt.f32 %v313_v53 }
 0x519   :  { %v125_v59 = vpop.permute.xlu0 %124 }
 0x51a   :  { %v127_v62 = vadd.f32 %v510_v6, %v125_v59 }
 0x520   :  { %v416_v55 = vpop.eup %415 }
 0x521   :  { %v316_v56 = vmul.f32 %v416_v55, %v315_v54 }
 0x523   :  { %319 = vperm.xlu1 %411, %v316_v56  }
 0x527   :  { %326 = vperm.xlu1 %411, %v323_v57  }
 0x5a2   :  { %v320_v58 = vpop.permute.xlu1 %319 }
 0x5a3   :  { %v322_v60 = vmul.f32 %v320_v58, %v307_v47 }
 0x5a6   :  { %v327_v61 = vpop.permute.xlu1 %326 }
 0x5a7   :  { %v329_v63 = vadd.f32 %v327_v61, %v322_v60 }
 0x5a9   :  { %v330_v0 = vadd.f32 %v329_v63, %v127_v62 }
 0x5ab   :  { %v331_v1 = vmax.f32 %v330_v0, 0.0 }
 0x5ad   :  { %332 = vst [vmem:[#allocation3] sm:$0xff] %v331_v1 }
 0x5ae   :  { %428 = shalt.err (!%p425_p4)
}
 0x5af   :  { %s429_s28 = scalar_lea.hbm %s571_s8, 128 }
 0x5b0   :  { %p430_p5 = scmp.ne.s32.totalorder %s571_s8, %s429_s28  ;;  %p433_p6 = scmp.lt.u32.totalorder %s429_s28, %s571_s8 }
 0x5b2   :  { %p435_p7 = pnand %p433_p6, %p430_p5 }
 0x5b4   :  { %438 = shalt.err (!%p435_p7)
}
 0x5b5   :  { %342 = dma.vmem_to_hbm [thread:$0]  %s340_s26, 128, %s571_s8, [#allocation4]  }
 0x5b6   :  { %439 = dma.done.wait [#allocation4], 128  }
 0x5b7   :  { %440 = vsyncadd [#allocation4], 4294967168 }
 0x5b8   :  { %346 = vsyncpa [#allocation4], 1 }

</bundles_post_ra>
